<compile_context>
chip_gen: v6e
topology: v6e:2x2x1
jax: 0.10.0
libtpu: 0.0.40
codegen_flags: <defaults>
</compile_context>

<pallas_src>
import jax
import jax.numpy as jnp
from jax import lax
from jax.experimental import pallas as pl
from jax.experimental.pallas import tpu as pltpu

LANES = 128
MAX_BLOCK_ROWS = 1024  # (1024, 128) f32 tile: 512 KiB per buffer


def _round_up(a: int, b: int) -> int:
    return ((a + b - 1) // b) * b


def dice_loss(inputs, targets, epsilon=1.0):
    """Pallas implementation of DiceLoss.forward (global reduction)."""
    x = jnp.ravel(inputs)
    t = jnp.ravel(targets)
    n = x.shape[0]

    # Pad only to a multiple of 128 lanes (zeros are neutral for both sums).
    pad = (-n) % LANES
    if pad:
        x = jnp.pad(x, (0, pad))
        t = jnp.pad(t, (0, pad))
    rows = (n + pad) // LANES
    x = x.reshape(rows, LANES)
    t = t.reshape(rows, LANES)

    # Sublane alignment for packed dtypes: 8 for f32, 16 for bf16, 32 for int8.
    itemsize = max(1, min(jnp.dtype(x.dtype).itemsize, jnp.dtype(t.dtype).itemsize))
    sublane_align = max(8, 32 // itemsize)
    block_rows = min(MAX_BLOCK_ROWS, _round_up(rows, sublane_align))
    grid_n = pl.cdiv(rows, block_rows)
    ragged = rows % block_rows  # Python int, known at trace time.
    groups = block_rows // 8

    def kernel(x_ref, t_ref, xt_out_ref, xpt_out_ref):
        xv = x_ref[...].astype(jnp.float32)
        tv = t_ref[...].astype(jnp.float32)

        if ragged:
            # Only the last tile can run past the valid rows; the out-of-range
            # rows hold unspecified data, so zero them before any arithmetic.
            i = pl.program_id(0)
            row_ids = lax.broadcasted_iota(jnp.int32, xv.shape, 0) + i * block_rows
            valid = row_ids < rows
            xv = jnp.where(valid, xv, 0.0)
            tv = jnp.where(valid, tv, 0.0)

        xt = xv * tv        # numerator terms
        xpt = xv + tv       # denominator terms

        # Fold (block_rows, 128) -> (8, 128): layout-preserving reshape (each
        # (8, 128) group is one native f32 tile) + leading-axis sum = pure
        # elementwise vreg adds on the VPU.  Lane-dense, full-vreg store.
        xt_out_ref[0] = jnp.sum(xt.reshape(groups, 8, LANES), axis=0)
        xpt_out_ref[0] = jnp.sum(xpt.reshape(groups, 8, LANES), axis=0)

    partials_xt, partials_xpt = pl.pallas_call(
        kernel,
        out_shape=(
            jax.ShapeDtypeStruct((grid_n, 8, LANES), jnp.float32),
            jax.ShapeDtypeStruct((grid_n, 8, LANES), jnp.float32),
        ),
        grid_spec=pltpu.PrefetchScalarGridSpec(
            num_scalar_prefetch=0,
            grid=(grid_n,),
            in_specs=[
                pl.BlockSpec((block_rows, LANES), lambda i: (i, 0)),
                pl.BlockSpec((block_rows, LANES), lambda i: (i, 0)),
            ],
            out_specs=[
                pl.BlockSpec((1, 8, LANES), lambda i: (i, 0, 0)),
                pl.BlockSpec((1, 8, LANES), lambda i: (i, 0, 0)),
            ],
        ),
        compiler_params=pltpu.CompilerParams(
            dimension_semantics=("parallel",),  # independent blocks -> megacore on v7x
        ),
    )(x, t)

    intersection = jnp.sum(partials_xt)
    sum_x_plus_t = jnp.sum(partials_xpt)
    dice = (2.0 * intersection + epsilon) / (sum_x_plus_t + epsilon)
    return 1.0 - dice


if __name__ == "__main__":
    key = jax.random.PRNGKey(0)
    k1, k2 = jax.random.split(key)

    # Small segmentation-style shapes: NCHW (2, 4, 16, 16)
    inputs = jax.nn.sigmoid(jax.random.normal(k1, (2, 4, 16, 16), dtype=jnp.float32))
    targets = (jax.random.uniform(k2, (2, 4, 16, 16)) > 0.5).astype(jnp.float32)

    loss_fn = jax.jit(dice_loss, static_argnames=("epsilon",))
    loss = jax.block_until_ready(loss_fn(inputs, targets, epsilon=1.0))

    # Plain-JAX reference (mirrors the PyTorch module exactly)
    xi, ti = jnp.ravel(inputs), jnp.ravel(targets)
    intersection = jnp.sum(xi * ti)
    ref = 1.0 - (2.0 * intersection + 1.0) / (jnp.sum(xi) + jnp.sum(ti) + 1.0)
    assert jnp.allclose(loss, ref, rtol=1e-5, atol=1e-5), (loss, ref)

    print("KERNEL_OK")
</pallas_src>

<mosaic_0001>
module attributes {stable_mosaic.version = 11 : i64} {
  func.func @kernel(%arg0: i32, %arg1: memref<16x128xf32, #tpu.memory_space<vmem>>, %arg2: memref<16x128xf32, #tpu.memory_space<vmem>>, %arg3: memref<1x8x128xf32, #tpu.memory_space<vmem>>, %arg4: memref<1x8x128xf32, #tpu.memory_space<vmem>>) attributes {dimension_semantics = [#tpu.dimension_semantics<parallel>], iteration_bounds = array<i64: 1>, scalar_prefetch = 0 : i64, scratch_operands = 0 : i64, tpu.core_type = #tpu.core_type<tc>, window_params = [{transform_indices = @transform_0, window_bounds = array<i64: 16, 128>}, {transform_indices = @transform_1, window_bounds = array<i64: 16, 128>}, {transform_indices = @transform_2, window_bounds = array<i64: 1, 8, 128>}, {transform_indices = @transform_3, window_bounds = array<i64: 1, 8, 128>}]} {
    %c0 = arith.constant 0 : index
    %c0_0 = arith.constant 0 : index
    %0 = vector.load %arg1[%c0, %c0_0] : memref<16x128xf32, #tpu.memory_space<vmem>>, vector<16x128xf32>
    %c0_1 = arith.constant 0 : index
    %c0_2 = arith.constant 0 : index
    %1 = vector.load %arg2[%c0_1, %c0_2] : memref<16x128xf32, #tpu.memory_space<vmem>>, vector<16x128xf32>
    %2 = arith.mulf %0, %1 : vector<16x128xf32>
    %3 = arith.addf %0, %1 : vector<16x128xf32>
    %4 = vector.shape_cast %2 : vector<16x128xf32> to vector<2x8x128xf32>
    %cst = arith.constant dense<0.000000e+00> : vector<8x128xf32>
    %5 = vector.multi_reduction <add>, %4, %cst [0] : vector<2x8x128xf32> to vector<8x128xf32>
    %c0_3 = arith.constant 0 : index
    %c0_4 = arith.constant 0 : index
    %c0_5 = arith.constant 0 : index
    %6 = vector.load %arg3[%c0_3, %c0_4, %c0_5] : memref<1x8x128xf32, #tpu.memory_space<vmem>>, vector<1x8x128xf32>
    %7 = vector.shape_cast %6 : vector<1x8x128xf32> to vector<8x128xf32>
    %8 = vector.shape_cast %5 : vector<8x128xf32> to vector<1x8x128xf32>
    tpu.vector_store %arg3[%c0_3, %c0_4, %c0_5], %8 {strides = array<i32>} : memref<1x8x128xf32, #tpu.memory_space<vmem>>, vector<1x8x128xf32>,
    %9 = vector.shape_cast %3 : vector<16x128xf32> to vector<2x8x128xf32>
    %cst_6 = arith.constant dense<0.000000e+00> : vector<8x128xf32>
    %10 = vector.multi_reduction <add>, %9, %cst_6 [0] : vector<2x8x128xf32> to vector<8x128xf32>
    %c0_7 = arith.constant 0 : index
    %c0_8 = arith.constant 0 : index
    %c0_9 = arith.constant 0 : index
    %11 = vector.load %arg4[%c0_7, %c0_8, %c0_9] : memref<1x8x128xf32, #tpu.memory_space<vmem>>, vector<1x8x128xf32>
    %12 = vector.shape_cast %11 : vector<1x8x128xf32> to vector<8x128xf32>
    %13 = vector.shape_cast %10 : vector<8x128xf32> to vector<1x8x128xf32>
    tpu.vector_store %arg4[%c0_7, %c0_8, %c0_9], %13 {strides = array<i32>} : memref<1x8x128xf32, #tpu.memory_space<vmem>>, vector<1x8x128xf32>,
    return
  }
  func.func @transform_0(%arg0: i32) -> (i32, i32) {
    %c0_i32 = arith.constant 0 : i32
    %c0_i32_0 = arith.constant 0 : i32
    return %arg0, %c0_i32 : i32, i32
  }
  func.func @transform_1(%arg0: i32) -> (i32, i32) {
    %c0_i32 = arith.constant 0 : i32
    %c0_i32_0 = arith.constant 0 : i32
    return %arg0, %c0_i32 : i32, i32
  }
  func.func @transform_2(%arg0: i32) -> (i32, i32, i32) {
    %c0_i32 = arith.constant 0 : i32
    %c0_i32_0 = arith.constant 0 : i32
    %c0_i32_1 = arith.constant 0 : i32
    return %arg0, %c0_i32, %c0_i32_0 : i32, i32, i32
  }
  func.func @transform_3(%arg0: i32) -> (i32, i32, i32) {
    %c0_i32 = arith.constant 0 : i32
    %c0_i32_0 = arith.constant 0 : i32
    %c0_i32_1 = arith.constant 0 : i32
    return %arg0, %c0_i32, %c0_i32_0 : i32, i32, i32
  }
}

</mosaic_0001>

<bundles_post_ra>
// kernel: dice_loss.1
= control target key start
LH: loop header
LB: loop body
LE: loop exit
PB: predicated region body
PF: predicated region fallthrough
CT: control target
= control target key end

     0   :  { %s71_s0 = inlined_call_operand.vmem [shape: f32[16,128], index: 0, kind: input, shape index: {}]   ;;  %s72_s1 = inlined_call_operand.vmem [shape: f32[16,128], index: 1, kind: input, shape index: {}]   ;;  %s73_s2 = inlined_call_operand.vmem [shape: f32[1,8,128], index: 2, kind: output, shape index: {0}]   ;;  %s74_s3 = inlined_call_operand.vmem [shape: f32[1,8,128], index: 3, kind: output, shape index: {1}]  }
   0x1   :  { %v13_v0 = vld [vmem:[%s71_s0] sm:$0xff]  ;;  %v14_v1 = vld [vmem:[%s71_s0 + $0x8] sm:$0xff] }
   0x2   :  { %v15_v2 = vld [vmem:[%s72_s1] sm:$0xff]  ;;  %v16_v3 = vld [vmem:[%s72_s1 + $0x8] sm:$0xff] }
   0x3   :  { %v17_v4 = vmul.f32 %v15_v2, %v13_v0  ;;  %v19_v5 = vadd.f32 %v15_v2, %v13_v0  ;;  %v18_v6 = vmul.f32 %v16_v3, %v14_v1  ;;  %v20_v7 = vadd.f32 %v16_v3, %v14_v1 }
   0x5   :  { %v21_v8 = vadd.f32 %v18_v6, %v17_v4  ;;  %v23_v9 = vadd.f32 %v20_v7, %v19_v5 }
   0x7   :  { %22 = vst [vmem:[%s73_s2] sm:$0xff] %v21_v8  ;;  %24 = vst [vmem:[%s74_s3] sm:$0xff] %v23_v9 }

</bundles_post_ra>
